<compile_context>
chip_gen: v7x
topology: tpu7x:2x2x1
jax: 0.10.0
libtpu: 0.0.40
codegen_flags: <defaults>
</compile_context>

<pallas_src>
import functools

import jax
import jax.numpy as jnp
from jax.experimental import pallas as pl
from jax.experimental.pallas import tpu as pltpu


def _single_output_kernel(x_ref, w0_ref, b0_ref, o_ref):
    # x_ref : [TILE_B, H] f32 VMEM (streamed tile, double-buffered by BlockSpec)
    # w0_ref: [1, H]      f32 VMEM (resident across grid steps)
    # b0_ref: [1, 1]      f32 VMEM (resident)
    # o_ref : [1, TILE_B] f32 VMEM (lane-dense output row for this tile)
    prod = x_ref[...] * w0_ref[...]                  # VPU multiply, bcast over rows
    y0 = jnp.sum(prod, axis=1, keepdims=True)        # XLU lane reduce -> [TILE_B, 1]
    y0 = y0 + b0_ref[...]                            # scalar bias broadcast
    sig = 1.0 / (1.0 + jnp.exp(-y0))                 # EUP exp (inf -> 0 for large -y0)
    o_ref[...] = jnp.transpose(sig)                  # XLU transpose -> [1, TILE_B], unmasked store


def _round_up(n, m):
    return ((n + m - 1) // m) * m


@functools.partial(jax.jit, static_argnames=("tile_b",))
def single_output_forward(x, w, b, *, tile_b=512):
    """x: [B, H] f32, w: [OUT, H] f32, b: [OUT] f32 -> [B] f32 = sigmoid((x @ w.T + b)[:, 0])."""
    B, H = x.shape
    # Only row 0 of W / element 0 of b contribute to output column 0.
    w0 = w[0:1, :]               # [1, H]  (no transpose needed)
    b0 = b[0].reshape(1, 1)      # [1, 1]

    # Batch tile selection:
    #  - single tile if the (8-padded) batch fits -> block == full array.
    #  - otherwise a 128-multiple tile so the lane-dense output block and the
    #    x block satisfy the (8, 128) tiling rule, and big enough (default 512
    #    rows) to amortize per-grid-step overhead / hit HBM roofline.
    if B <= tile_b:
        tb = _round_up(B, 8)
    else:
        tb = _round_up(tile_b, 128)
    bp = _round_up(B, tb)
    if bp != B:
        x = jnp.pad(x, ((0, bp - B), (0, 0)))   # padded rows -> discarded below
    num_tiles = bp // tb

    out = pl.pallas_call(
        _single_output_kernel,
        out_shape=jax.ShapeDtypeStruct((1, bp), jnp.float32),
        grid=(num_tiles,),
        in_specs=[
            pl.BlockSpec((tb, H), lambda i: (i, 0)),   # x: streamed batch tiles
            pl.BlockSpec((1, H), lambda i: (0, 0)),    # w0: resident in VMEM
            pl.BlockSpec((1, 1), lambda i: (0, 0)),    # b0: resident in VMEM
        ],
        out_specs=pl.BlockSpec((1, tb), lambda i: (0, i)),  # lane-dense output row
        compiler_params=pltpu.CompilerParams(
            dimension_semantics=("parallel",),   # batch axis: megacore-shardable
        ),
        cost_estimate=pl.CostEstimate(
            flops=2 * bp * H,
            transcendentals=bp,
            bytes_accessed=4 * (bp * H + H + 1 + bp),
        ),
    )(x, w0, b0)
    return out[0, :B]


if __name__ == "__main__":
    B, H, OUT = 8, 32, 16

    key = jax.random.PRNGKey(0)
    kx, kw, kb = jax.random.split(key, 3)

    x = jax.random.normal(kx, (B, H), dtype=jnp.float32)
    # Deterministic "Linear" inner-model parameters (synthetic, not a checkpoint).
    w = jax.random.normal(kw, (OUT, H), dtype=jnp.float32) * 0.1
    b = jax.random.normal(kb, (OUT,), dtype=jnp.float32) * 0.1

    out = single_output_forward(x, w, b)
    jax.block_until_ready(out)

    # Pure-JAX reference: sigmoid of column 0 of the full Linear output.
    ref = jax.nn.sigmoid((x @ w.T + b)[:, 0])
    assert out.shape == (B,)
    assert jnp.allclose(out, ref, atol=1e-5), (out, ref)

    print("KERNEL_OK")
</pallas_src>

<mosaic_0001>
module attributes {stable_mosaic.version = 11 : i64} {
  func.func @_single_output_kernel(%arg0: i32, %arg1: memref<8x32xf32, #tpu.memory_space<vmem>>, %arg2: memref<1x32xf32, #tpu.memory_space<vmem>>, %arg3: memref<1x1xf32, #tpu.memory_space<vmem>>, %arg4: memref<1x8xf32, #tpu.memory_space<vmem>>) attributes {dimension_semantics = [#tpu.dimension_semantics<parallel>], iteration_bounds = array<i64: 1>, scalar_prefetch = 0 : i64, scratch_operands = 0 : i64, tpu.core_type = #tpu.core_type<tc>, window_params = [{transform_indices = @transform_0, window_bounds = array<i64: 8, 32>}, {pipeline_mode = #tpu.pipeline_mode<synchronous>, transform_indices = @transform_1, window_bounds = array<i64: 1, 32>}, {pipeline_mode = #tpu.pipeline_mode<synchronous>, transform_indices = @transform_2, window_bounds = array<i64: 1, 1>}, {transform_indices = @transform_3, window_bounds = array<i64: 1, 8>}]} {
    %c0 = arith.constant 0 : index
    %c0_0 = arith.constant 0 : index
    %0 = vector.load %arg1[%c0, %c0_0] : memref<8x32xf32, #tpu.memory_space<vmem>>, vector<8x32xf32>
    %c0_1 = arith.constant 0 : index
    %c0_2 = arith.constant 0 : index
    %1 = vector.load %arg2[%c0_1, %c0_2] : memref<1x32xf32, #tpu.memory_space<vmem>>, vector<1x32xf32>
    %2 = vector.broadcast %1 : vector<1x32xf32> to vector<8x32xf32>
    %3 = arith.mulf %0, %2 : vector<8x32xf32>
    %cst = arith.constant dense<0.000000e+00> : vector<8xf32>
    %4 = vector.multi_reduction <add>, %3, %cst [1] : vector<8x32xf32> to vector<8xf32>
    %5 = vector.shape_cast %4 : vector<8xf32> to vector<8x1xf32>
    %c0_3 = arith.constant 0 : index
    %c0_4 = arith.constant 0 : index
    %6 = vector.load %arg3[%c0_3, %c0_4] : memref<1x1xf32, #tpu.memory_space<vmem>>, vector<1x1xf32>
    %7 = vector.broadcast %6 : vector<1x1xf32> to vector<8x1xf32>
    %8 = arith.addf %5, %7 : vector<8x1xf32>
    %cst_5 = arith.constant 0.000000e+00 : f32
    %9 = vector.broadcast %cst_5 : f32 to vector<8x1xf32>
    %10 = arith.subf %9, %8 : vector<8x1xf32>
    %11 = math.exp %10 : vector<8x1xf32>
    %cst_6 = arith.constant 1.000000e+00 : f32
    %12 = vector.broadcast %cst_6 : f32 to vector<8x1xf32>
    %13 = arith.addf %12, %11 : vector<8x1xf32>
    %cst_7 = arith.constant 1.000000e+00 : f32
    %14 = vector.broadcast %cst_7 : f32 to vector<8x1xf32>
    %15 = arith.divf %14, %13 : vector<8x1xf32>
    %16 = tpu.transpose %15, [1, 0] : vector<8x1xf32> -> vector<1x8xf32>
    %c0_8 = arith.constant 0 : index
    %c0_9 = arith.constant 0 : index
    %17 = vector.load %arg4[%c0_8, %c0_9] : memref<1x8xf32, #tpu.memory_space<vmem>>, vector<1x8xf32>
    tpu.vector_store %arg4[%c0_8, %c0_9], %16 {strides = array<i32>} : memref<1x8xf32, #tpu.memory_space<vmem>>, vector<1x8xf32>,
    return
  }
  func.func @transform_0(%arg0: i32) -> (i32, i32) {
    %c0_i32 = arith.constant 0 : i32
    %c0_i32_0 = arith.constant 0 : i32
    return %arg0, %c0_i32 : i32, i32
  }
  func.func @transform_1(%arg0: i32) -> (i32, i32) {
    %c0_i32 = arith.constant 0 : i32
    %c0_i32_0 = arith.constant 0 : i32
    %c0_i32_1 = arith.constant 0 : i32
    return %c0_i32, %c0_i32_0 : i32, i32
  }
  func.func @transform_2(%arg0: i32) -> (i32, i32) {
    %c0_i32 = arith.constant 0 : i32
    %c0_i32_0 = arith.constant 0 : i32
    %c0_i32_1 = arith.constant 0 : i32
    return %c0_i32, %c0_i32_0 : i32, i32
  }
  func.func @transform_3(%arg0: i32) -> (i32, i32) {
    %c0_i32 = arith.constant 0 : i32
    %c0_i32_0 = arith.constant 0 : i32
    return %c0_i32, %arg0 : i32, i32
  }
}

</mosaic_0001>

<bundles_post_ra>
// kernel: single_output_forward.1
= control target key start
LH: loop header
LB: loop body
LE: loop exit
PB: predicated region body
PF: predicated region fallthrough
CT: control target
= control target key end

     0   :  { %s166_s0 = inlined_call_operand.vmem [shape: f32[8,32], index: 0, kind: input, shape index: {}]   ;;  %s167_s1 = inlined_call_operand.vmem [shape: f32[1,32], index: 1, kind: input, shape index: {}]   ;;  %s168_s2 = inlined_call_operand.<no memory space> [shape: f32[1,1], index: 2, kind: input, shape index: {}]   ;;  %s169_s3 = inlined_call_operand.hbm [shape: f32[1,8], index: 3, kind: output, shape index: {}]  }
   0x1   :  { %v8_v0 = vstv %s168_s2 }
   0x2   :  { %9 = vst [vmem:[#allocation2] sm:$0x1] %v8_v0 }
   0x3   :  { %v17_v1 = vld [vmem:[%s166_s0] sm:$0xff]  ;;  %vm26_vm0 = vcmask 261120  }
   0x4   :  { %v92_v2 = vld [vmem:[%s167_s1] ss:$0 sm:$0xff] }
   0x5   :  { %v25_v3 = vmul.f32 %v92_v2, %v17_v1 }
   0x6   :  { %10 = vsyncpa [#allocation4], 0  ;;  %s124_s0 = smov [#allocation3]   ;;  %vm76_vm1 = vcmask 57344  }
   0x7   :  { %v27_v4 = vsel %vm26_vm0, %v25_v3, 0.0  ;;  %s84_s2 = sshll.u32 %s124_s0, 4  ;;  %s85_s2 = int_to_ptr.vmem [resolvable:$true] %s84_s2 }
   0x8   :  { %28 = vadd.xlane.f32.xlu0 %v27_v4  ;;  %s100_s1 = scalar_lea.vmem %s85_s2, 16  ;;  %s104_s18 = scalar_lea.vmem %s85_s2, 32 }
   0x9   :  { %v93_v5 = vld [vmem:[#allocation2] ss:$0 sm:$0xff]  ;;  %p101_p0 = scmp.ne.s32.totalorder %s85_s2, %s100_s1  ;;  %p105_p1 = scmp.lt.s32.totalorder %s85_s2, %s85_s2 }
   0xa   :  { %p106_p2 = scmp.lt.s32.totalorder %s104_s18, %s100_s1 }
   0xc   :  { %p107_p3 = por %p106_p2, %p105_p1 }
   0xe   :  { %p108_p4 = pnand %p107_p3, %p101_p0 }
  0x95   :  { %v29_v6 = vpop.xlane.xlu0 %28 }
  0x96   :  { %v37_v7 = vadd.f32 %v93_v5, %v29_v6 }
  0x98   :  { %v38_v8 = vsub.f32 0.0, %v37_v7 }
  0x9a   :  { %v39_v9 = vmul.f32 1.442695, %v38_v8 }
  0x9c   :  { %96 = vpow2.f32 %v39_v9 }
  0xa6   :  { %v97_v10 = vpop.eup %96 }
  0xa7   :  { %v41_v11 = vadd.f32 1.0, %v97_v10 }
  0xa9   :  { %98 = vrcp.f32 %v41_v11 }
  0xb3   :  { %v99_v12 = vpop.eup %98 }
  0xb4   :  { %44 = vxpose.xlu0.b32.start.end [1/1] (short) (narrow) %v99_v12, 8 }
 0x134   :  { %v60_v13 = vpop.trf.xlu0 }
 0x135   :  { %77 = vst.msk [vmem:[#allocation3] sm:$0x1] %vm76_vm1, %v60_v13 }
 0x136   :  { %111 = shalt.err (!%p108_p4)
}
 0x137   :  { %s112_s21 = scalar_lea.hbm %s169_s3, 16 }
 0x138   :  { %p113_p5 = scmp.ne.s32.totalorder %s169_s3, %s112_s21  ;;  %p116_p6 = scmp.lt.u32.totalorder %s112_s21, %s169_s3 }
 0x13a   :  { %p118_p7 = pnand %p116_p6, %p113_p5 }
 0x13c   :  { %121 = shalt.err (!%p118_p7)
}
 0x13d   :  { %87 = dma.vmem_to_hbm [thread:$0]  %s85_s2, 16, %s169_s3, [#allocation4]  }
 0x13e   :  { %122 = dma.done.wait [#allocation4], 16  }
 0x13f   :  { %123 = vsyncadd [#allocation4], 4294967280 }
 0x140   :  { %91 = vsyncpa [#allocation4], 1 }

</bundles_post_ra>
